<compile_context>
chip_gen: v7x
topology: tpu7x:2x2x1
jax: 0.10.0
libtpu: 0.0.40
codegen_flags: <defaults>
</compile_context>

<pallas_src>
import functools

import jax
import jax.numpy as jnp
from jax.experimental import pallas as pl
from jax.experimental.pallas import tpu as pltpu


def _round_up(x: int, m: int) -> int:
    return ((x + m - 1) // m) * m


# ----------------------------- Pallas kernel --------------------------------
def _acov_kernel(frames_ref, csw_ref, dinv_ref, out_ref):
    """LocalPatterns.autocovariance for a (tile_m, n) block of frames."""
    eps = jnp.finfo(jnp.float32).eps
    f = frames_ref[...].astype(jnp.float32)                    # (tm, n)

    # frame / clamp(max |frame|, eps); divide moved to the EUP via vrcp.
    m = jnp.maximum(jnp.max(jnp.abs(f), axis=-1, keepdims=True), eps)
    fn = (f * pl.reciprocal(m, approx=True)).astype(jnp.bfloat16)

    # fused windowed real DFT: csw = [win*cos | win*sin] -> one MXU pass.
    ri = jnp.dot(fn, csw_ref[...], preferred_element_type=jnp.float32)
    k_pad = csw_ref.shape[1] // 2                               # lane-aligned split
    re = ri[:, :k_pad]
    im = ri[:, k_pad:]

    # spectrum = rfft(windowed)**2 ; spectrum.real = re^2 - im^2
    s = ((re - im) * (re + im)).astype(jnp.bfloat16)

    # irfft of the REAL one-sided spectrum; last-axis ifftshift baked into dinv.
    y = jnp.dot(s, dinv_ref[...], preferred_element_type=jnp.float32)
    out_ref[...] = y.astype(out_ref.dtype)


def _const_weight_spec(shape, single_buffer):
    """BlockSpec for a grid-constant operand (index_map is always (0, 0)).

    For large weights, request single buffering: the DFT matrices never change
    across the grid, so the default double buffer is pure VMEM waste (worth
    ~3 MiB at kernel_size=1023 -> headroom for bigger row tiles on v7x)."""
    if single_buffer and hasattr(pl, "Buffered"):
        try:
            return pl.BlockSpec(shape, lambda i: (0, 0),
                                pipeline_mode=pl.Buffered(1))
        except TypeError:                 # older jax without pipeline_mode kwarg
            pass
    return pl.BlockSpec(shape, lambda i: (0, 0))


def _autocov_rows(frames, csw, dinv, out_dtype, *, max_tile_m=1024,
                  vmem_budget_bytes=30 * 1024 * 1024):
    """Run the autocovariance kernel over rows: (R, n) -> (R, n) in out_dtype."""
    R, n = frames.shape
    k2 = csw.shape[1]                      # 2 * k_pad
    kp = dinv.shape[0]                     # k_pad
    in_b = jnp.dtype(frames.dtype).itemsize
    out_b = jnp.dtype(out_dtype).itemsize

    weight_bytes = (n * k2 + kp * n) * 2                     # bf16 csw + dinv
    single_buffer_weights = weight_bytes >= (1 << 20)
    weight_vmem = weight_bytes * (1 if single_buffer_weights else 2)

    # Conservative per-row working set: pipelined in/out buffers (x2 each),
    # f32/bf16 frame copies, f32 `ri`, bf16 spectrum, f32 irfft result.
    per_row = (2 * n * in_b + 2 * n * out_b
               + n * 4 + n * 2
               + k2 * 4 + kp * 2
               + n * 4)
    rows_fit = max(8, int((vmem_budget_bytes - weight_vmem) // per_row) // 8 * 8)
    tile_m = max(8, min(max_tile_m, rows_fit))
    # Keep >= 2 grid steps so the "parallel" axis can shard across v7x's two
    # TensorCores (one extra ~0.35us step costs nothing when R is tiny).
    tile_m = max(8, min(tile_m, _round_up(pl.cdiv(R, 2), 8)))

    R_pad = _round_up(R, tile_m)
    if R_pad != R:
        frames = jnp.pad(frames, ((0, R_pad - R), (0, 0)))

    # Right-size the VMEM request (v7x only has 64 MiB/TC) with headroom for
    # compiler-internal scratch; never ask for more than 44 MiB.
    est = weight_vmem + tile_m * per_row
    vmem_limit = min(max(int(est * 1.25) + (4 << 20), 16 << 20), 44 << 20)

    out = pl.pallas_call(
        _acov_kernel,
        out_shape=jax.ShapeDtypeStruct((R_pad, n), out_dtype),
        grid_spec=pltpu.PrefetchScalarGridSpec(
            num_scalar_prefetch=0,
            grid=(R_pad // tile_m,),
            in_specs=[
                pl.BlockSpec((tile_m, n), lambda i: (i, 0)),           # frames
                _const_weight_spec((n, k2), single_buffer_weights),    # [cos|sin]
                _const_weight_spec((kp, n), single_buffer_weights),    # inverse DFT
            ],
            out_specs=pl.BlockSpec((tile_m, n), lambda i: (i, 0)),
        ),
        compiler_params=pltpu.CompilerParams(
            dimension_semantics=("parallel",),
            vmem_limit_bytes=vmem_limit),
    )(frames, csw, dinv)
    return out if R_pad == R else out[:R]


def _autocov_rows_xla(frames, csw, dinv, out_dtype):
    """Fused-XLA fallback with identical math (for very small row counts)."""
    eps = jnp.finfo(jnp.float32).eps
    f = frames.astype(jnp.float32)
    m = jnp.maximum(jnp.max(jnp.abs(f), axis=-1, keepdims=True), eps)
    fn = (f / m).astype(jnp.bfloat16)
    ri = jnp.dot(fn, csw, preferred_element_type=jnp.float32)
    kp = csw.shape[1] // 2
    re, im = ri[:, :kp], ri[:, kp:]
    s = ((re - im) * (re + im)).astype(jnp.bfloat16)
    return jnp.dot(s, dinv, preferred_element_type=jnp.float32).astype(out_dtype)


# ------------------------------- JAX glue ------------------------------------
def _dft_matrices(n: int):
    """bf16 [win*cos | win*sin] forward matrix (n, 2*k_pad) and the shifted
    inverse-DFT matrix (k_pad, n).  k_pad = round_up(n//2+1, 128) keeps the
    rfft-bin axis lane-dense; the zero rows/cols are numerically inert.
    (Inefficient for tiny kernel_size; the default 1023 -> K=512 has no waste.)"""
    K = n // 2 + 1
    k_pad = _round_up(K, 128)

    jj = jnp.arange(n, dtype=jnp.float32)
    kk = jnp.arange(K, dtype=jnp.float32)

    # torch.hann_window(n) (periodic=True default): 0.5 * (1 - cos(2*pi*j/n))
    win = 0.5 - 0.5 * jnp.cos(2.0 * jnp.pi * jj / n)

    ang = 2.0 * jnp.pi * jj[:, None] * kk[None, :] / n              # (n, K)
    cw = win[:, None] * jnp.cos(ang)                                # Re part
    sw = win[:, None] * jnp.sin(ang)     # sign irrelevant: only im^2 is used
    cw = jnp.pad(cw, ((0, 0), (0, k_pad - K)))
    sw = jnp.pad(sw, ((0, 0), (0, k_pad - K)))
    csw = jnp.concatenate([cw, sw], axis=1)                         # (n, 2*k_pad)

    # irfft of a REAL one-sided spectrum s (exactly what the module feeds it,
    # spectrum.real):  y[m] = (1/n) * sum_k w_k * s_k * cos(2*pi*k*m/n)
    wk = jnp.full((K,), 2.0, dtype=jnp.float32).at[0].set(1.0)
    if n % 2 == 0:
        wk = wk.at[K - 1].set(1.0)                                  # Nyquist
    angi = 2.0 * jnp.pi * kk[:, None] * jj[None, :] / n             # (K, n)
    dinv = (wk[:, None] / n) * jnp.cos(angi)
    # fold the LAST-axis ifftshift (roll by -(n//2)) into the inverse matrix
    dinv = jnp.roll(dinv, -(n // 2), axis=1)
    dinv = jnp.pad(dinv, ((0, k_pad - K), (0, 0)))
    return csw.astype(jnp.bfloat16), dinv.astype(jnp.bfloat16)


def _sample_positions_envelope(key, Xp, n_positions, kernel_size):
    """LocalPatterns.sample_using_envelope (Dirichlet sampling, JAX RNG key)."""
    eps = jnp.finfo(Xp.dtype).eps
    stride = kernel_size // 4
    B, C, Lp = Xp.shape
    n_win = (Lp - kernel_size) // stride + 1       # F.avg_pool1d output length

    sq = Xp * Xp
    csum = jnp.concatenate(
        [jnp.zeros((B, C, 1), Xp.dtype), jnp.cumsum(sq, axis=-1)], axis=-1)
    starts = jnp.arange(n_win) * stride
    env = (csum[..., starts + kernel_size] - csum[..., starts]) / kernel_size
    env = jnp.maximum(env / (1.0 + jnp.abs(env)), eps)              # softsign+clamp

    alpha = env.reshape(B * C, n_win)
    samples = jax.random.dirichlet(key, alpha)                      # (B*C, n_win)
    _, idx = jax.lax.top_k(samples, n_positions)                    # largest first
    positions = (idx * stride).astype(jnp.int32)
    return positions.reshape(B, C, n_positions)


def local_pattern_filter_forward(X, key, *, in_channels, out_channels,
                                 kernel_size, sample_mode="envelope",
                                 frames_dtype=jnp.bfloat16,
                                 max_tile_m=1024, min_rows_for_pallas=0):
    """Forward pass of LocalPatternFilter: (B, C, L) -> (B, H, C, kernel_size)."""
    B, C, L = X.shape
    assert C == in_channels
    n = kernel_size
    H = out_channels

    # PadForConv(kernel_size, pad_mode='zero')
    # TODO(synk): PadForConv source not provided; assumed zero-pad of the tail
    # to the next multiple of kernel_size (only used for position sampling).
    L_pad = _round_up(L, n)
    Xp = jnp.pad(X, ((0, 0), (0, 0), (0, L_pad - L)))

    if sample_mode == "envelope":
        positions = _sample_positions_envelope(key, Xp, H, n)        # (B, C, H)
    elif sample_mode == "fixed":
        end = max(L_pad - 2 * n - 1, 0)
        pos = jnp.linspace(0.0, float(end), H).astype(jnp.int32)
        positions = jnp.broadcast_to(pos[None, None, :], (B, C, H))
    else:
        # TODO(synk): 'zero_crossing' needs zero_crossing_score / gumbel_softmax /
        # samples_like whose sources are not provided.
        raise NotImplementedError(sample_mode)

    # Frames are gathered from the UNPADDED X (as in the reference); clamp so
    # every window stays in range (the reference can index OOB for positions
    # sampled near the padded tail — clamping only affects those cases).
    positions = jnp.clip(positions, 0, max(L - n, 0)).astype(jnp.int32)

    # ---- fused gather: transpose + leading-axis ifftshift folded in ----------
    # The module produces acov of shape (B, C*H, C, n) and then applies
    # torch.fft.ifftshift(dim=None), which rolls EVERY axis by -(size//2).
    # The last axis is folded into the inverse-DFT matrix; the (B, C*H, C)
    # roll is a pure row permutation, so rows are gathered directly in the
    # final output order (no post-kernel transpose / roll / slice passes).
    HC = C * H
    pos_flat = positions.reshape(B, HC)
    b_src = (jnp.arange(B) + B // 2) % B
    r_src = (jnp.arange(HC) + HC // 2) % HC
    c_src = (jnp.arange(C) + C // 2) % C

    bc = b_src[:, None, None] * C + c_src[None, None, :]             # (B, 1, C)
    bc = jnp.broadcast_to(bc, (B, HC, C)).reshape(-1)                # (Rows,)
    row_pos = pos_flat[b_src][:, r_src]                              # (B, HC)
    row_pos = jnp.broadcast_to(row_pos[:, :, None], (B, HC, C)).reshape(-1)

    X_flat = X.reshape(B * C, L)
    gather_idx = row_pos[:, None] + jnp.arange(n, dtype=jnp.int32)[None, :]
    # frames_rows[rho] = X[b', c', pos[b', r'] : pos[b', r'] + n]
    frames_rows = X_flat[bc[:, None], gather_idx].astype(frames_dtype)

    # LocalPatterns.autocovariance — Pallas hot path (or XLA below threshold).
    csw, dinv = _dft_matrices(n)
    rows = B * HC * C
    if rows < min_rows_for_pallas:
        acov = _autocov_rows_xla(frames_rows, csw, dinv, X.dtype)
    else:
        acov = _autocov_rows(frames_rows, csw, dinv, X.dtype,
                             max_tile_m=max_tile_m)
    acov = acov.reshape(B, HC, C, n)

    # Mirrors the module's assert (requires in_channels == 1 in practice).
    assert acov.shape == (B, out_channels, in_channels, kernel_size), acov.shape
    return acov


if __name__ == "__main__":
    key = jax.random.PRNGKey(0)
    kx, ks = jax.random.split(key)

    B, in_channels, L = 2, 1, 400
    out_channels, kernel_size = 8, 63        # small analogue of defaults (…, 1023)

    X = jax.random.normal(kx, (B, in_channels, L), dtype=jnp.float32)

    fwd = jax.jit(functools.partial(
        local_pattern_filter_forward,
        in_channels=in_channels, out_channels=out_channels,
        kernel_size=kernel_size, sample_mode="envelope"))
    out = fwd(X, ks)
    jax.block_until_ready(out)

    assert out.shape == (B, out_channels, in_channels, kernel_size), out.shape
    assert bool(jnp.all(jnp.isfinite(out)))

    # Cross-check the Pallas path against the identical-math fused-XLA path
    # (same positions, same bf16 DFT matrices; only accumulation order and the
    # approximate reciprocal differ), catching any grid/tiling/indexing bug.
    ref_fwd = jax.jit(functools.partial(
        local_pattern_filter_forward,
        in_channels=in_channels, out_channels=out_channels,
        kernel_size=kernel_size, sample_mode="envelope",
        min_rows_for_pallas=1 << 30))
    ref = ref_fwd(X, ks)
    jax.block_until_ready(ref)
    err = float(jnp.max(jnp.abs(out - ref)))
    scale = float(jnp.max(jnp.abs(ref))) + 1e-6
    assert err <= 2e-2 * scale + 1e-3, (err, scale)

    print("KERNEL_OK")
</pallas_src>

<mosaic_0001>
module attributes {stable_mosaic.version = 11 : i64} {
  func.func @_acov_kernel(%arg0: i32, %arg1: memref<8x63xbf16, #tpu.memory_space<vmem>>, %arg2: memref<63x256xbf16, #tpu.memory_space<vmem>>, %arg3: memref<128x63xbf16, #tpu.memory_space<vmem>>, %arg4: memref<8x63xf32, #tpu.memory_space<vmem>>) attributes {dimension_semantics = [#tpu.dimension_semantics<parallel>], iteration_bounds = array<i64: 2>, scalar_prefetch = 0 : i64, scratch_operands = 0 : i64, tpu.core_type = #tpu.core_type<tc>, window_params = [{transform_indices = @transform_0, window_bounds = array<i64: 8, 63>}, {pipeline_mode = #tpu.pipeline_mode<synchronous>, transform_indices = @transform_1, window_bounds = array<i64: 63, 256>}, {pipeline_mode = #tpu.pipeline_mode<synchronous>, transform_indices = @transform_2, window_bounds = array<i64: 128, 63>}, {transform_indices = @transform_3, window_bounds = array<i64: 8, 63>}]} {
    %c0 = arith.constant 0 : index
    %c0_0 = arith.constant 0 : index
    %0 = vector.load %arg1[%c0, %c0_0] : memref<8x63xbf16, #tpu.memory_space<vmem>>, vector<8x63xbf16>
    %1 = arith.extf %0 : vector<8x63xbf16> to vector<8x63xf32>
    %2 = math.absf %1 : vector<8x63xf32>
    %cst = arith.constant dense<0xFF800000> : vector<8xf32>
    %3 = vector.multi_reduction <maximumf>, %2, %cst [1] : vector<8x63xf32> to vector<8xf32>
    %4 = vector.shape_cast %3 : vector<8xf32> to vector<8x1xf32>
    %cst_1 = arith.constant 1.1920929E-7 : f32
    %5 = vector.broadcast %cst_1 : f32 to vector<8x1xf32>
    %6 = arith.maximumf %4, %5 : vector<8x1xf32>
    %7 = tpu.reciprocal %6 {approx = true} : vector<8x1xf32> -> vector<8x1xf32>
    %8 = vector.broadcast %7 : vector<8x1xf32> to vector<8x63xf32>
    %9 = arith.mulf %1, %8 : vector<8x63xf32>
    %10 = arith.truncf %9 : vector<8x63xf32> to vector<8x63xbf16>
    %c0_2 = arith.constant 0 : index
    %c0_3 = arith.constant 0 : index
    %11 = vector.load %arg2[%c0_2, %c0_3] : memref<63x256xbf16, #tpu.memory_space<vmem>>, vector<63x256xbf16>
    %cst_4 = arith.constant dense<0.000000e+00> : vector<8x256xf32>
    %12 = tpu.matmul %10, %11, %cst_4 {dimension_numbers = #tpu.dot_dimension_numbers<[1], [0], [0], [1], [0, 0, 1, 1], [], []>} : vector<8x63xbf16>, vector<63x256xbf16>, vector<8x256xf32> -> vector<8x256xf32>
    %13 = vector.extract_strided_slice %12 {offsets = [0, 0], sizes = [8, 128], strides = [1, 1]} : vector<8x256xf32> to vector<8x128xf32>
    %14 = vector.extract_strided_slice %12 {offsets = [0, 128], sizes = [8, 128], strides = [1, 1]} : vector<8x256xf32> to vector<8x128xf32>
    %15 = arith.subf %13, %14 : vector<8x128xf32>
    %16 = arith.addf %13, %14 : vector<8x128xf32>
    %17 = arith.mulf %15, %16 : vector<8x128xf32>
    %18 = arith.truncf %17 : vector<8x128xf32> to vector<8x128xbf16>
    %c0_5 = arith.constant 0 : index
    %c0_6 = arith.constant 0 : index
    %19 = vector.load %arg3[%c0_5, %c0_6] : memref<128x63xbf16, #tpu.memory_space<vmem>>, vector<128x63xbf16>
    %cst_7 = arith.constant dense<0.000000e+00> : vector<8x63xf32>
    %20 = tpu.matmul %18, %19, %cst_7 {dimension_numbers = #tpu.dot_dimension_numbers<[1], [0], [0], [1], [0, 0, 1, 1], [], []>} : vector<8x128xbf16>, vector<128x63xbf16>, vector<8x63xf32> -> vector<8x63xf32>
    %c0_8 = arith.constant 0 : index
    %c0_9 = arith.constant 0 : index
    %21 = vector.load %arg4[%c0_8, %c0_9] : memref<8x63xf32, #tpu.memory_space<vmem>>, vector<8x63xf32>
    tpu.vector_store %arg4[%c0_8, %c0_9], %20 {strides = array<i32>} : memref<8x63xf32, #tpu.memory_space<vmem>>, vector<8x63xf32>,
    return
  }
  func.func @transform_0(%arg0: i32) -> (i32, i32) {
    %c0_i32 = arith.constant 0 : i32
    %c0_i32_0 = arith.constant 0 : i32
    return %arg0, %c0_i32 : i32, i32
  }
  func.func @transform_1(%arg0: i32) -> (i32, i32) {
    %c0_i32 = arith.constant 0 : i32
    %c0_i32_0 = arith.constant 0 : i32
    %c0_i32_1 = arith.constant 0 : i32
    return %c0_i32, %c0_i32_0 : i32, i32
  }
  func.func @transform_2(%arg0: i32) -> (i32, i32) {
    %c0_i32 = arith.constant 0 : i32
    %c0_i32_0 = arith.constant 0 : i32
    %c0_i32_1 = arith.constant 0 : i32
    return %c0_i32, %c0_i32_0 : i32, i32
  }
  func.func @transform_3(%arg0: i32) -> (i32, i32) {
    %c0_i32 = arith.constant 0 : i32
    %c0_i32_0 = arith.constant 0 : i32
    return %arg0, %c0_i32 : i32, i32
  }
}

</mosaic_0001>

<bundles_post_ra>
// kernel: local_pattern_filter_forward.1
= control target key start
LH: loop header
LB: loop body
LE: loop exit
PB: predicated region body
PF: predicated region fallthrough
CT: control target
= control target key end

     0   :  { %8 = vsyncpa [#allocation3], 0  ;;  %s821_s0 = inlined_call_operand.vmem [shape: bf16[16,63], index: 0, kind: input, shape index: {}]   ;;  %s822_s1 = inlined_call_operand.vmem [shape: bf16[63,256], index: 1, kind: input, shape index: {}]   ;;  %s823_s2 = inlined_call_operand.vmem [shape: bf16[128,63], index: 2, kind: input, shape index: {}]   ;;  %s824_s3 = inlined_call_operand.hbm [shape: f32[16,63], index: 3, kind: output, shape index: {}]  }
   0x1   :  { %10 = vsyncpa [#allocation3 + $0x1], 0  ;;  %s670_s12 = smov 0   ;;  %s672_s13 = smov 0  }
   0x2   :  { %s674_s14 = smov 0   ;;  %s676_s15 = smov 0  }
   0x3 LB: > { %s691_s16 = sadd.s32 4294967295, %s643_s15   ;;  %s460_s17 = sadd.s32 4294967294, %s643_s15   ;;  %s643_s15 = sphi %s676_s15, %s830_s15   ;;  %s639_s14 = sphi %s674_s14, %s829_s14   ;;  %s635_s13 = sphi %s672_s13, %s828_s13   ;;  %s631_s12 = sphi %s670_s12, %s827_s12  }
   0x4   : > { %s695_s18 = sadd.s32 1, %s643_s15   ;;  %s91_s19 = sadd.s32 1, %s639_s14 }
   0x5   : > { %s88_s20 = ssub.s32 %s643_s15, %s695_s18  ;;  %p101_p0 = scmp.ne.s32.totalorder %s639_s14, %s635_s13 }
   0x6   : > { %p89_p1 = scmp.eq.s32.totalorder %s88_s20, 0  ;;  %p102_p2 = scmp.eq.s32.totalorder %s691_s16, 1 }
   0x7   : > { %p107_p3 = scmp.ne.s32.totalorder %s635_s13, %s631_s12  ;;  %p108_p4 = scmp.eq.s32.totalorder %s460_s17, 1 }
   0x8   : > { %s706_s21 = scalar_select %p89_p1, %s639_s14, %s91_s19  }
   0x9   : > { %p708_p5 = por %p102_p2, %p101_p0  ;;  %p712_p6 = por %p108_p4, %p107_p3 }
   0xa   : > { %p463_p7 = scmp.ge.s32.totalorder %s643_s15, 1  ;;  %p139_p8 = scmp.lt.s32.totalorder %s643_s15, 3 }
   0xc   : > { %p140_p9 = pnand %p463_p7, %p139_p8 }
   0xd   : > { %p162_p10 = scmp.lt.s32.totalorder (!%p140_p9), %s691_s16, 1  ;;  %vm170_vm0 = vcmask (!%p140_p9), 515072   ;;  %v559_v4 = vld [vmem:[%s822_s1 + $0x4] ss:$8 sps:$4 sm:$0xff] (!%p140_p9)   ;;  %v561_v5 = vld [vmem:[%s822_s1] ss:$8 sps:$4 sm:$0xff] (!%p140_p9)  }
   0xe   : > { %143 = sbr.rel (%p140_p9) target bundleno = 636 (0x27c), region = 32  ;;  %237 = vmatprep.subr.bf16.mxu0 (!%p140_p9), %v559_v4  ;;  %v562_v6 = vld [vmem:[%s822_s1 + $0x14] ss:$8 sps:$4 sm:$0xff] (!%p140_p9)   ;;  %v564_v7 = vld [vmem:[%s822_s1 + $0x10] ss:$8 sps:$4 sm:$0xff] (!%p140_p9)   ;;  %vm227_vm1 = vcmask (!%p140_p9), 1046528  }
   0xf   : > { %238 = vmatpush1.bf16.msra.mxu0 (!%p140_p9), %v561_v5  ;;  %v565_v8 = vld [vmem:[%s822_s1 + $0x24] ss:$8 sps:$4 sm:$0xff] (!%p140_p9)   ;;  %v568_v9 = vld [vmem:[%s822_s1 + $0x34] ss:$8 sps:$4 sm:$0xff] (!%p140_p9)   ;;  %vm228_vm2 = vcmask (!%p140_p9), 1047552   ;;  %v645_v10 = vmov (!%p140_p9), 65535  }
  0x10   : > { %239 = vmatprep.subr.bf16.mxu0 (!%p140_p9), %v562_v6  ;;  %v229_v11 = vsel (!%p140_p9), %vm227_vm1, 4294967295, %v645_v10  ;;  %v646_v12 = vmov (!%p140_p9), 0   ;;  %v567_v13 = vld [vmem:[%s822_s1 + $0x20] ss:$8 sps:$4 sm:$0xff] (!%p140_p9)   ;;  %v570_v15 = vld [vmem:[%s822_s1 + $0x30] ss:$8 sps:$4 sm:$0xff] (!%p140_p9)  }
  0x11   : > { %269 = vmatprep.mubr.bf16.mxu0 (!%p140_p9), %v646_v12  ;;  %v230_v14 = vsel (!%p140_p9), %vm228_vm2, %v229_v11, 0  ;;  %v571_v18 = vld [vmem:[%s823_s2] sm:$0xff] (!%p140_p9)   ;;  %v647_v19 = vmov (!%p140_p9), 0.0   ;;  %v572_v20 = vld [vmem:[%s823_s2 + $0x8] sm:$0xff] (!%p140_p9)   ;;  %v573_v21 = vld [vmem:[%s823_s2 + $0x10] sm:$0xff] (!%p140_p9)   ;;  %vm648_vm3 = vmmov (!%p140_p9), 0  }
  0x12   : > { %v235_v16 = vand.u32 (!%p140_p9), %v568_v9, %v230_v14  ;;  %v232_v17 = vand.u32 (!%p140_p9), %v570_v15, %v230_v14  ;;  %496 = vmatprep.subr.bf16.mxu1 (!%p140_p9), %v647_v19  ;;  %v574_v22 = vld [vmem:[%s823_s2 + $0x18] sm:$0xff] (!%p140_p9)   ;;  %v575_v23 = vld [vmem:[%s823_s2 + $0x20] sm:$0xff] (!%p140_p9)   ;;  %v576_v24 = vld [vmem:[%s823_s2 + $0x28] sm:$0xff] (!%p140_p9)   ;;  %512 = vmatprep.mubr.msk.bf16.mxu1 (!%p140_p9), %vm648_vm3, %v647_v19  ;;  %s484_s27 = sshll.u32 (!%p140_p9), %s691_s16, 7 }
  0x13   : > { %240 = vmatpush1.bf16.msra.mxu0 (!%p140_p9), %v564_v7  ;;  %497 = vmatpush3.bf16.msra.mxu1 (!%p140_p9), %v571_v18  ;;  %v577_v30 = vld [vmem:[%s823_s2 + $0x30] sm:$0xff] (!%p140_p9)   ;;  %v578_v31 = vld [vmem:[%s823_s2 + $0x38] sm:$0xff] (!%p140_p9)   ;;  %s778_s5 = scalar_lea.hbm (!%p140_p9), %s824_s3, %s484_s27 }
  0x14   : > { %241 = vmatprep.subr.bf16.mxu0 (!%p140_p9), %v565_v8  ;;  %498 = vmatprep.subr.bf16.mxu1 (!%p140_p9), %v647_v19 }
  0x15   : > { %s163_s24 = scalar_select %p162_p10, %s691_s16, 1 }
  0x16   : > { %s649_s16 = smov [#allocation2]  }
  0x17   : > { %s465_s25 = sshll.u32 %s163_s24, 2  ;;  %242 = vmatpush1.bf16.msra.mxu0 %v567_v13  ;;  %499 = vmatpush3.bf16.msra.mxu1 %v572_v20  ;;  %s585_s8 = sshll.u32 %s649_s16, 4  ;;  %s586_s8 = int_to_ptr.vmem [resolvable:$false] %s585_s8 }
  0x18   : > { %s165_s28 = scalar_lea.vmem %s821_s0, %s465_s25  ;;  %243 = vmatprep.subr.bf16.mxu0 %v235_v16  ;;  %500 = vmatprep.subr.bf16.mxu1 %v647_v19  ;;  %s159_s25 = sand.u32 1, %s635_s13  }
  0x19   : > { %v167_v0 = vld [vmem:[%s165_s28] sm:$0xf]  ;;  %s464_s26 = sshll.u32 %s159_s25, 3  ;;  %s388_s6 = scalar_lea.sflag [#allocation3], %s159_s25 }
  0x1a   : > { %v168_v1 = vunpack.c.l.bf16 %v167_v0  ;;  %s161_s28 = scalar_lea.vmem [#allocation2], %s464_s26  ;;  %s587_s9 = scalar_lea.vmem %s586_s8, 256 }
  0x1b   : > { %244 = vmatpush1.bf16.msra.mxu0 %v232_v17  ;;  %501 = vmatpush3.bf16.msra.mxu1 %v573_v21  ;;  %s401_s29 = sshll.u32 %s161_s28, 4  ;;  %s780_s29 = int_to_ptr.vmem [resolvable:$true] %s401_s29 }
  0x1c   : > { %v169_v2 = vand.u32 2147483647, %v168_v1  ;;  %502 = vmatprep.subr.bf16.mxu1 %v647_v19  ;;  %s581_s7 = scalar_lea.vmem %s780_s29, 128  ;;  %p588_p0 = scmp.lt.s32.totalorder %s780_s29, %s586_s8 }
  0x1d   : > { %p582_p11 = scmp.ne.s32.totalorder %s780_s29, %s581_s7  ;;  %p589_p1 = scmp.lt.s32.totalorder %s587_s9, %s581_s7 }
  0x1e   : > { %v171_v3 = vsel %vm170_vm0, %v169_v2, -inf }
  0x1f   : > { %172 = vmax.xlane.f32.xlu0 %v171_v3  ;;  %503 = vmatpush3.bf16.msra.mxu1 %v574_v22  ;;  %p583_p12 = pnand %p582_p11, %p708_p5  ;;  %p590_p2 = por %p589_p1, %p588_p0 }
  0x20   : > { %504 = vmatprep.subr.bf16.mxu1 %v647_v19 }
  0x21   : > { %p584_p13 = pneg %p583_p12 }
  0x23   : > { %505 = vmatpush3.bf16.msra.mxu1 %v575_v23  ;;  %p591_p3 = pnand %p590_p2, %p584_p13 }
  0x24   : > { %506 = vmatprep.subr.bf16.mxu1 %v647_v19 }
  0x27   : > { %507 = vmatpush3.bf16.msra.mxu1 %v576_v24 }
  0x28   : > { %508 = vmatprep.subr.bf16.mxu1 %v647_v19 }
  0x2b   : > { %509 = vmatpush3.bf16.msra.mxu1 %v577_v30 }
  0x2c   : > { %510 = vmatprep.subr.bf16.mxu1 %v647_v19 }
  0x2f   : > { %511 = vmatpush3.bf16.msra.mxu1 %v578_v31 }
  0xac   : > { %v173_v25 = vpop.xlane.xlu0 %172 }
  0xad   : > { %v174_v26 = vmax.f32 %v173_v25, 1.1920929e-07 }
  0xaf   : > { %579 = vrcp.f32 %v174_v26 }
  0xb9   : > { %v580_v27 = vpop.eup %579 }
  0xba   : > { %v176_v28 = vmul.f32 %v580_v27, %v168_v1 }
  0xbc   : > { %v177_v29 = vpack.c.bf16 %v176_v28, %v176_v28 }
  0xbe   : > { %474 = vmatmul.mubr.msk.bf16.vlgmr.msra.gmra.mrb[0].mxu0 %vm170_vm0, %v177_v29 }
 0x191   : > { %v271_v32 = vpop.f32.mrb[0].mxu0 }
 0x192   : > { %v273_v33 = vpop.f32.mrb[1].mxu0 }
 0x193   : > { %v278_v34 = vsub.f32 %v271_v32, %v273_v33  ;;  %v279_v35 = vadd.f32 %v273_v33, %v271_v32  ;;  %v275_v36 = vpop.f32.mrb[2].mxu0 }
 0x194   : > { %v276_v37 = vpop.f32.mrb[3].mxu0 }
 0x195   : > { %v280_v38 = vmul.f32 %v279_v35, %v278_v34 }
 0x197   : > { %v281_v39 = vpack.c.bf16 %v280_v38, %v280_v38 }
 0x199   : > { %513 = vmatmul.mubr.bf16.vlgmr.msra.gmra.mrb[0].mxu1 %v281_v39 }
 0x26c   : > { %v380_v40 = vpop.f32.mrb[0].mxu1 }
 0x26d   : > { %386 = vst.msk [vmem:[%s161_s28] sm:$0xff] %vm170_vm0, %v380_v40  ;;  %v514_v41 = vpop.f32.mrb[1].mxu1 }
 0x26e   : > { %v383_v42 = vpop.f32.mrb[2].mxu1 }
 0x26f   : > { %594 = shalt.err (!%p591_p3)
}
 0x270   : > { %s595_s10 = scalar_lea.hbm %s778_s5, 128  ;;  %s599_s19 = scalar_lea.hbm %s824_s3, 256 }
 0x271   : > { %p596_p4 = scmp.ne.s32.totalorder %s778_s5, %s595_s10  ;;  %p600_p9 = scmp.lt.u32.totalorder %s778_s5, %s824_s3 }
 0x272   : > { %p601_p10 = scmp.lt.u32.totalorder %s599_s19, %s595_s10  ;;  %p603_p12 = scmp.lt.u32.totalorder %s595_s10, %s778_s5 }
 0x273   : > { %p597_p7 = pnand %p596_p4, %p708_p5 }
 0x274   : > { %p602_p11 = por %p601_p10, %p600_p9 }
 0x275   : > { %p598_p8 = pneg %p597_p7 }
 0x276   : > { %p604_p13 = por %p603_p12, %p602_p11 }
 0x278   : > { %p605_p0 = pnand %p604_p13, %p598_p8 }
 0x27a   : > { %608 = shalt.err (!%p605_p0)
}
 0x27b   : > { %516 = dma.vmem_to_hbm [thread:$0]  (%p708_p5), %s780_s29, 128, %s778_s5, %s388_s6   ;;  %v515_v43 = vpop.f32.mrb[3].mxu1 }
 0x27c PF: > { %p522_p1 = scmp.ge.s32.totalorder %s643_s15, 2  ;;  %s413_s25 = sand.u32 1, %s631_s12  }
 0x27d   : > { %s414_s26 = scalar_lea.sflag [#allocation3], %s413_s25 }
 0x27e   : > { %p519_p2 = pnand %p522_p1, %p712_p6 }
 0x280   : > { %626 = dma.done.wait (!%p519_p2), %s414_s26, 128  }
 0x281   : > { %628 = vsyncadd (!%p519_p2), %s414_s26, 4294967168  ;;  %p13_p3 = scmp.ge.s32.totalorder %s695_s18, 4   ;;  %s827_s12 = smov %s635_s13 }
 0x282   : > { %s828_s13 = smov %s639_s14  ;;  %s829_s14 = smov %s706_s21 }
 0x283   : > { %s830_s15 = smov %s695_s18  ;;  %15 = sbr.rel (!%p13_p3) target bundleno = 3 (0x3), region = 67 }
 0x28a   :  { %419 = vsyncpa [#allocation3], 1 }
 0x28b   :  { %421 = vsyncpa [#allocation3 + $0x1], 1 }

</bundles_post_ra>
